<compile_context>
chip_gen: v6e
topology: v6e:2x2x1
jax: 0.10.0
libtpu: 0.0.40
codegen_flags: <defaults>
</compile_context>

<pallas_src>
import functools

import jax
import jax.numpy as jnp
from jax import lax
from jax.experimental import pallas as pl
from jax.experimental.pallas import tpu as pltpu


_TARGET_BLOCK_BYTES = 2 * 1024 * 1024  # ~2 MiB per input block per buffer


def _cdiv(a, b):
    return -(-a // b)


def _round_up(x, m):
    return ((x + m - 1) // m) * m


def _vfl_kernel(pred_ref, gt_ref, label_ref, out_ref, acc_ref, *,
                alpha, lanes, tile_rows, blocks_per_split, num_blocks,
                tail_rows, has_phantom):
    i = pl.program_id(1)  # reduction ("arbitrary") axis

    p = pred_ref[...].astype(jnp.float32)
    g = gt_ref[...].astype(jnp.float32)
    lab = label_ref[...].astype(jnp.float32)

    # weight = alpha*p^2*(1-lab) + g*lab  ==  a + lab*(g - a),  a = alpha*p^2
    a = alpha * (p * p)
    weight = a + lab * (g - a)
    # PyTorch BCE clamps the log terms at -100:
    #   bce = -(g*log(p) + (1-g)*log(1-p)) = -(log1mp + g*(logp - log1mp))
    log_p = jnp.maximum(jnp.log(p), -100.0)
    log_1mp = jnp.maximum(jnp.log(1.0 - p), -100.0)
    loss = -(log_1mp + g * (log_p - log_1mp)) * weight

    if tile_rows % 8 != 0:
        # Tiny input (rows < 8): the whole problem is one full block and one
        # grid step; reduce straight into the output.
        out_ref[...] = jnp.broadcast_to(jnp.sum(loss), out_ref.shape)
        return

    @pl.when(i == 0)
    def _init():
        acc_ref[...] = jnp.zeros_like(acc_ref)

    def rowsum(x):
        # (tile_rows, lanes) -> (8, lanes): 8-row groups summed with pure VPU
        # vreg adds (reshape stays on sublane-tile boundaries, no XLU).
        return x.reshape(tile_rows // 8, 8, lanes).sum(axis=0)

    tail_partial = tail_rows != tile_rows  # static python bool

    if (not tail_partial) and (not has_phantom):
        # Fast path: every block is full and real -- no masking anywhere.
        acc_ref[...] += rowsum(loss)
    else:
        bi = pl.program_id(0) * blocks_per_split + i
        full_limit = (num_blocks - 1) if tail_partial else num_blocks

        @pl.when(bi < full_limit)
        def _full_block():
            acc_ref[...] += rowsum(loss)

        if tail_partial:
            @pl.when(bi == num_blocks - 1)
            def _last_block():
                # Only the single partial trailing block masks its garbage rows.
                row = lax.broadcasted_iota(jnp.int32, loss.shape, 0)
                acc_ref[...] += rowsum(jnp.where(row < tail_rows, loss, 0.0))
        # Blocks with bi >= num_blocks (phantom tile of an odd split) skip the
        # accumulate entirely; their index_map is clamped to a valid block.

    @pl.when(i == pl.num_programs(1) - 1)
    def _finalize():
        out_ref[...] = jnp.broadcast_to(jnp.sum(acc_ref[...]), out_ref.shape)


def varifocal_loss(pred_score, gt_score, label, alpha=0.75, gamma=2.0, *,
                   lanes=None, max_tile_rows=None):
    assert gamma == 2.0, "kernel is specialized for gamma == 2.0"
    assert pred_score.shape == gt_score.shape == label.shape

    total = int(pred_score.size)
    itemsize = int(jnp.dtype(pred_score.dtype).itemsize)

    # Lane width: prefer one that divides `total` so the wrapper is a pure
    # (free) reshape with no padding copy through HBM.
    if lanes is None:
        lanes = 512
        for cand in (1024, 512, 256, 128):
            if total % cand == 0:
                lanes = cand
                break
    assert lanes % 128 == 0

    rows = _cdiv(total, lanes)
    padded_total = rows * lanes

    # Row tile: target ~2 MiB per input block (multiple of 8 rows, <= rows).
    target_rows = max(8, (_TARGET_BLOCK_BYTES // (lanes * itemsize)) // 8 * 8)
    if max_tile_rows is not None:
        target_rows = min(target_rows, max(8, _round_up(max_tile_rows, 8)))
    if rows >= 8:
        tile_rows = min(target_rows, (rows // 8) * 8)
    else:
        tile_rows = rows  # tiny input: single full (rows, lanes) block

    num_blocks = _cdiv(rows, tile_rows)
    # 2-way split feeds both TensorCores on dual-TC chips; on single-TC chips
    # it is just one extra (cheap) finalize step.
    num_splits = 2 if num_blocks >= 2 else 1
    blocks_per_split = _cdiv(num_blocks, num_splits)
    has_phantom = num_splits * blocks_per_split > num_blocks
    tail_rows = rows - (num_blocks - 1) * tile_rows  # rows in the last block

    def prep(x, pad_val):
        x = x.reshape(-1)                     # free reshape, native dtype
        if padded_total != total:             # small identity-value pad only
            x = jnp.pad(x, (0, padded_total - total), constant_values=pad_val)
        return x.reshape(rows, lanes)

    # Identity pad: BCE(pred=1, gt=1) * weight(pred=1, gt=1, label=0) == 0.
    p2 = prep(pred_score, 1.0)
    g2 = prep(gt_score, 1.0)
    l2 = prep(label, 0.0)

    kernel = functools.partial(
        _vfl_kernel, alpha=float(alpha), lanes=lanes, tile_rows=tile_rows,
        blocks_per_split=blocks_per_split, num_blocks=num_blocks,
        tail_rows=tail_rows, has_phantom=has_phantom)

    if has_phantom:
        # Clamp the phantom block of an odd split to a valid block index; the
        # kernel skips its accumulate.
        in_index = lambda c, i: (jnp.minimum(c * blocks_per_split + i,
                                             num_blocks - 1), 0)
    else:
        in_index = lambda c, i: (c * blocks_per_split + i, 0)
    in_spec = pl.BlockSpec((tile_rows, lanes), in_index)

    out = pl.pallas_call(
        kernel,
        out_shape=jax.ShapeDtypeStruct((num_splits * 8, 128), jnp.float32),
        grid_spec=pltpu.PrefetchScalarGridSpec(
            num_scalar_prefetch=0,
            grid=(num_splits, blocks_per_split),
            in_specs=[in_spec, in_spec, in_spec],
            out_specs=pl.BlockSpec((8, 128), lambda c, i: (c, 0)),
            scratch_shapes=[pltpu.VMEM((8, lanes), jnp.float32)],
        ),
        compiler_params=pltpu.CompilerParams(
            dimension_semantics=("parallel", "arbitrary"),
            vmem_limit_bytes=32 * 1024 * 1024,
        ),
    )(p2, g2, l2)

    # Each split wrote its scalar partial broadcast over one (8, 128) block.
    partials = out.reshape(num_splits, 8, 128)[:, 0, 0]
    return jnp.sum(partials)


def varifocal_loss_ref(pred_score, gt_score, label, alpha=0.75, gamma=2.0):
    p = pred_score.astype(jnp.float32)
    g = gt_score.astype(jnp.float32)
    lab = label.astype(jnp.float32)
    weight = alpha * jnp.power(p, gamma) * (1.0 - lab) + g * lab
    bce = -(g * jnp.maximum(jnp.log(p), -100.0)
            + (1.0 - g) * jnp.maximum(jnp.log(1.0 - p), -100.0))
    return jnp.sum(bce * weight)


if __name__ == "__main__":
    key = jax.random.PRNGKey(0)

    def make_inputs(shape, k, dtype=jnp.float32):
        k1, k2, k3 = jax.random.split(k, 3)
        pred = jax.nn.sigmoid(jax.random.normal(k1, shape, jnp.float32))
        gt = jax.random.uniform(k2, shape, jnp.float32)
        lab = (jax.random.uniform(k3, shape) > 0.7).astype(jnp.float32)
        return pred.astype(dtype), gt.astype(dtype), lab.astype(dtype)

    k0, k1, k2, k3 = jax.random.split(key, 4)
    checks = []

    # 1) Typical small VFL input [batch, anchors, classes]; element count is a
    #    multiple of 512 -> zero-copy reshape path, single tiny block.
    pred, gt, lab = make_inputs((2, 8, 32), k0)
    got = jax.block_until_ready(varifocal_loss(pred, gt, lab))
    want = varifocal_loss_ref(pred, gt, lab)
    checks.append(bool(jnp.allclose(got, want, rtol=1e-4, atol=1e-3)))

    # 2) Ragged element count with tiny tiles -> identity-padded lane tail,
    #    partial last row-block (masked under pl.when) and a phantom block on
    #    the second split.
    pred, gt, lab = make_inputs((4, 300, 7), k1)
    got = jax.block_until_ready(
        varifocal_loss(pred, gt, lab, lanes=512, max_tile_rows=8))
    want = varifocal_loss_ref(pred, gt, lab)
    checks.append(bool(jnp.allclose(got, want, rtol=1e-4, atol=1e-3)))

    # 3) Clean multi-block 2-way split: no padding, no masking anywhere.
    pred, gt, lab = make_inputs((2, 1024, 64), k2)
    got = jax.block_until_ready(
        varifocal_loss(pred, gt, lab, max_tile_rows=32))
    want = varifocal_loss_ref(pred, gt, lab)
    checks.append(bool(jnp.allclose(got, want, rtol=1e-4, atol=1e-3)))

    # 4) bf16 inputs (half the HBM bytes; kernel upcasts to f32 internally).
    pred, gt, lab = make_inputs((4, 300, 7), k3, dtype=jnp.bfloat16)
    got = jax.block_until_ready(varifocal_loss(pred, gt, lab))
    want = varifocal_loss_ref(pred, gt, lab)
    checks.append(bool(jnp.allclose(got, want, rtol=2e-2, atol=1e-1)))

    assert all(checks), f"varifocal loss kernel mismatch: {checks}"
    print("KERNEL_OK")
</pallas_src>

<mosaic_0001>
module attributes {stable_mosaic.version = 11 : i64} {
  func.func @_vfl_kernel(%arg0: i32, %arg1: i32, %arg2: memref<1x512xf32, #tpu.memory_space<vmem>>, %arg3: memref<1x512xf32, #tpu.memory_space<vmem>>, %arg4: memref<1x512xf32, #tpu.memory_space<vmem>>, %arg5: memref<8x128xf32, #tpu.memory_space<vmem>>, %arg6: memref<8x512xf32, #tpu.memory_space<vmem>>) attributes {dimension_semantics = [#tpu.dimension_semantics<parallel>, #tpu.dimension_semantics<arbitrary>], iteration_bounds = array<i64: 1, 1>, scalar_prefetch = 0 : i64, scratch_operands = 1 : i64, tpu.core_type = #tpu.core_type<tc>, window_params = [{transform_indices = @transform_0, window_bounds = array<i64: 1, 512>}, {transform_indices = @transform_1, window_bounds = array<i64: 1, 512>}, {transform_indices = @transform_2, window_bounds = array<i64: 1, 512>}, {transform_indices = @transform_3, window_bounds = array<i64: 8, 128>}]} {
    %c0 = arith.constant 0 : index
    %c0_0 = arith.constant 0 : index
    %0 = vector.load %arg2[%c0, %c0_0] : memref<1x512xf32, #tpu.memory_space<vmem>>, vector<1x512xf32>
    %c0_1 = arith.constant 0 : index
    %c0_2 = arith.constant 0 : index
    %1 = vector.load %arg3[%c0_1, %c0_2] : memref<1x512xf32, #tpu.memory_space<vmem>>, vector<1x512xf32>
    %c0_3 = arith.constant 0 : index
    %c0_4 = arith.constant 0 : index
    %2 = vector.load %arg4[%c0_3, %c0_4] : memref<1x512xf32, #tpu.memory_space<vmem>>, vector<1x512xf32>
    %3 = arith.mulf %0, %0 : vector<1x512xf32>
    %cst = arith.constant 7.500000e-01 : f32
    %4 = vector.broadcast %cst : f32 to vector<1x512xf32>
    %5 = arith.mulf %4, %3 : vector<1x512xf32>
    %6 = arith.subf %1, %5 : vector<1x512xf32>
    %7 = arith.mulf %2, %6 : vector<1x512xf32>
    %8 = arith.addf %5, %7 : vector<1x512xf32>
    %9 = math.log %0 : vector<1x512xf32>
    %cst_5 = arith.constant -1.000000e+02 : f32
    %10 = vector.broadcast %cst_5 : f32 to vector<1x512xf32>
    %11 = arith.maximumf %9, %10 : vector<1x512xf32>
    %cst_6 = arith.constant 1.000000e+00 : f32
    %12 = vector.broadcast %cst_6 : f32 to vector<1x512xf32>
    %13 = arith.subf %12, %0 : vector<1x512xf32>
    %14 = math.log %13 : vector<1x512xf32>
    %cst_7 = arith.constant -1.000000e+02 : f32
    %15 = vector.broadcast %cst_7 : f32 to vector<1x512xf32>
    %16 = arith.maximumf %14, %15 : vector<1x512xf32>
    %17 = arith.subf %11, %16 : vector<1x512xf32>
    %18 = arith.mulf %1, %17 : vector<1x512xf32>
    %19 = arith.addf %16, %18 : vector<1x512xf32>
    %cst_8 = arith.constant 0.000000e+00 : f32
    %20 = vector.broadcast %cst_8 : f32 to vector<1x512xf32>
    %21 = arith.subf %20, %19 : vector<1x512xf32>
    %22 = arith.mulf %21, %8 : vector<1x512xf32>
    %23 = vector.shape_cast %22 : vector<1x512xf32> to vector<1x1x512xf32>
    %cst_9 = arith.constant dense<0.000000e+00> : vector<1xf32>
    %24 = vector.multi_reduction <add>, %23, %cst_9 [1, 2] : vector<1x1x512xf32> to vector<1xf32>
    %25 = vector.shape_cast %24 : vector<1xf32> to vector<1x1x1xf32>
    %26 = vector.extract %25[0, 0, 0] : f32 from vector<1x1x1xf32>
    %27 = vector.broadcast %26 : f32 to vector<8x128xf32>
    %c0_10 = arith.constant 0 : index
    %c0_11 = arith.constant 0 : index
    %28 = vector.load %arg5[%c0_10, %c0_11] : memref<8x128xf32, #tpu.memory_space<vmem>>, vector<8x128xf32>
    tpu.vector_store %arg5[%c0_10, %c0_11], %27 {strides = array<i32>} : memref<8x128xf32, #tpu.memory_space<vmem>>, vector<8x128xf32>,
    return
  }
  func.func @transform_0(%arg0: i32, %arg1: i32) -> (i32, i32) {
    %c1_i32 = arith.constant 1 : i32
    %0 = arith.muli %arg0, %c1_i32 : i32
    %1 = arith.addi %0, %arg1 : i32
    %c0_i32 = arith.constant 0 : i32
    %c0_i32_0 = arith.constant 0 : i32
    return %1, %c0_i32 : i32, i32
  }
  func.func @transform_1(%arg0: i32, %arg1: i32) -> (i32, i32) {
    %c1_i32 = arith.constant 1 : i32
    %0 = arith.muli %arg0, %c1_i32 : i32
    %1 = arith.addi %0, %arg1 : i32
    %c0_i32 = arith.constant 0 : i32
    %c0_i32_0 = arith.constant 0 : i32
    return %1, %c0_i32 : i32, i32
  }
  func.func @transform_2(%arg0: i32, %arg1: i32) -> (i32, i32) {
    %c1_i32 = arith.constant 1 : i32
    %0 = arith.muli %arg0, %c1_i32 : i32
    %1 = arith.addi %0, %arg1 : i32
    %c0_i32 = arith.constant 0 : i32
    %c0_i32_0 = arith.constant 0 : i32
    return %1, %c0_i32 : i32, i32
  }
  func.func @transform_3(%arg0: i32, %arg1: i32) -> (i32, i32) {
    %c0_i32 = arith.constant 0 : i32
    %c0_i32_0 = arith.constant 0 : i32
    return %arg0, %c0_i32 : i32, i32
  }
}

</mosaic_0001>

<bundles_post_ra>
// kernel: tpu_custom_call.1
= control target key start
LH: loop header
LB: loop body
LE: loop exit
PB: predicated region body
PF: predicated region fallthrough
CT: control target
= control target key end

     0   :  { %8 = vsyncpa [#allocation4], 0  ;;  %s273_s0 = inlined_call_operand.hbm [shape: f32[1,512], index: 0, kind: input, shape index: {}]   ;;  %s274_s1 = inlined_call_operand.hbm [shape: f32[1,512], index: 1, kind: input, shape index: {}]   ;;  %s275_s2 = inlined_call_operand.hbm [shape: f32[1,512], index: 2, kind: input, shape index: {}]   ;;  %s276_s3 = inlined_call_operand.hbm [shape: f32[8,128], index: 3, kind: output, shape index: {}]  }
   0x1   :  { %9 = vsyncpa [#allocation7], 0 }
   0x2   :  { %10 = vsyncpa [#allocation5], 0  ;;  %s237_s12 = smov [#allocation6]   ;;  %s238_s14 = smov [#allocation3]  }
   0x3   :  { %s35_s13 = sshll.u32 %s237_s12, 4  ;;  %s21_s15 = sshll.u32 %s238_s14, 4  ;;  %s36_s13 = int_to_ptr.vmem [resolvable:$true] %s35_s13  ;;  %s22_s15 = int_to_ptr.vmem [resolvable:$true] %s21_s15 }
   0x4   :  { %s159_s16 = scalar_lea.vmem %s36_s13, 64  ;;  %p164_p1 = scmp.lt.s32.totalorder %s36_s13, %s36_s13 }
   0x5   :  { %p160_p0 = scmp.ne.s32.totalorder %s36_s13, %s159_s16  ;;  %p165_p2 = scmp.lt.s32.totalorder %s159_s16, %s159_s16 }
   0x7   :  { %p166_p3 = por %p165_p2, %p164_p1 }
   0x9   :  { %p167_p4 = pnand %p166_p3, %p160_p0 }
   0xb   :  { %170 = shalt.err (!%p167_p4)
}
   0xc   :  { %38 = dma.hbm_to_vmem [thread:$0]  %s274_s1, 64, %s36_s13, [#allocation7]  }
   0xd   :  { %s179_s19 = scalar_lea.vmem %s22_s15, 64  ;;  %p184_p6 = scmp.lt.s32.totalorder %s22_s15, %s22_s15 }
   0xe   :  { %p180_p5 = scmp.ne.s32.totalorder %s22_s15, %s179_s19  ;;  %p185_p7 = scmp.lt.s32.totalorder %s179_s19, %s179_s19 }
  0x10   :  { %p186_p8 = por %p185_p7, %p184_p6 }
  0x12   :  { %p187_p9 = pnand %p186_p8, %p180_p5 }
  0x14   :  { %190 = shalt.err (!%p187_p9)
}
  0x15   :  { %24 = dma.hbm_to_vmem [thread:$0]  %s273_s0, 64, %s22_s15, [#allocation4]  }
  0x16   :  { %s239_s22 = smov [#allocation8]  }
  0x17   :  { %s49_s23 = sshll.u32 %s239_s22, 4  ;;  %s50_s23 = int_to_ptr.vmem [resolvable:$true] %s49_s23 }
  0x18   :  { %s199_s24 = scalar_lea.vmem %s50_s23, 64  ;;  %p204_p11 = scmp.lt.s32.totalorder %s50_s23, %s50_s23 }
  0x19   :  { %p200_p10 = scmp.ne.s32.totalorder %s50_s23, %s199_s24  ;;  %p205_p12 = scmp.lt.s32.totalorder %s199_s24, %s199_s24 }
  0x1b   :  { %p206_p13 = por %p205_p12, %p204_p11 }
  0x1d   :  { %p207_p0 = pnand %p206_p13, %p200_p10 }
  0x1f   :  { %210 = shalt.err (!%p207_p0)
}
  0x20   :  { %52 = dma.hbm_to_vmem [thread:$0]  %s275_s2, 64, %s50_s23, [#allocation7]  }
  0x21   :  { %231 = dma.done.wait [#allocation4], 64  }
  0x22   :  { %232 = vsyncadd [#allocation4], 4294967232 }
  0x23   :  { %233 = dma.done.wait [#allocation7], 128  }
  0x24   :  { %234 = vsyncadd [#allocation7], 4294967168  ;;  %v65_v0 = vld [vmem:[#allocation3] sm:$0xf]  ;;  %v66_v5 = vld [vmem:[#allocation6] sm:$0xf]  ;;  %v86_v12 = vlaneseq }
  0x25   :  { %147 = vlog2.f32 %v65_v0  ;;  %v76_v1 = vsub.f32 1.0, %v65_v0  ;;  %v68_v2 = vmul.f32 %v65_v0, %v65_v0  ;;  %v67_v11 = vld [vmem:[#allocation8] sm:$0xf]  ;;  %vm106_vm0 = vcmask 1040384   ;;  %s240_s0 = smov [#allocation9]  }
  0x26   :  { %v87_v16 = vshrl.u32 %v86_v12, 7  ;;  %s131_s2 = sshll.u32 %s240_s0, 4  ;;  %s132_s2 = int_to_ptr.vmem [resolvable:$true] %s131_s2 }
  0x27   :  { %149 = vlog2.f32 %v76_v1  ;;  %v69_v3 = vmul.f32 0.75, %v68_v2  ;;  %s211_s27 = scalar_lea.vmem %s132_s2, 128  ;;  %p216_p2 = scmp.lt.s32.totalorder %s132_s2, %s132_s2 }
  0x28   :  { %v88_v20 = vsub.s32 0, %v87_v16  ;;  %v92_v22 = vsub.s32 1, %v87_v16  ;;  %v96_v23 = vsub.s32 2, %v87_v16  ;;  %v100_v24 = vsub.s32 3, %v87_v16  ;;  %p212_p1 = scmp.ne.s32.totalorder %s132_s2, %s211_s27  ;;  %p217_p3 = scmp.lt.s32.totalorder %s211_s27, %s211_s27 }
  0x29   :  { %v70_v8 = vsub.f32 %v66_v5, %v69_v3 }
  0x2a   :  { %p218_p4 = por %p217_p3, %p216_p2 }
  0x2b   :  { %v71_v14 = vmul.f32 %v70_v8, %v67_v11 }
  0x2c   :  { %p219_p5 = pnand %p218_p4, %p212_p1 }
  0x2d   :  { %v72_v18 = vadd.f32 %v71_v14, %v69_v3 }
  0x32   :  { %v148_v4 = vpop.eup %147 }
  0x33   :  { %v74_v6 = vmul.f32 0.6931472, %v148_v4 }
  0x34   :  { %v150_v7 = vpop.eup %149 }
  0x35   :  { %v75_v9 = vmax.f32 %v74_v6, -100.0  ;;  %v78_v10 = vmul.f32 0.6931472, %v150_v7 }
  0x37   :  { %v79_v13 = vmax.f32 %v78_v10, -100.0 }
  0x39   :  { %v80_v15 = vsub.f32 %v75_v9, %v79_v13 }
  0x3b   :  { %v81_v17 = vmul.f32 %v80_v15, %v66_v5 }
  0x3d   :  { %v82_v19 = vadd.f32 %v81_v17, %v79_v13 }
  0x3f   :  { %v83_v21 = vsub.f32 0.0, %v82_v19 }
  0x41   :  { %v84_v25 = vmul.f32 %v83_v21, %v72_v18 }
  0x43   :  { %v89_v26 = vrot.slane %v84_v25, %v88_v20  ;;  %v93_v27 = vrot.slane %v84_v25, %v92_v22  ;;  %v97_v28 = vrot.slane %v84_v25, %v96_v23  ;;  %v101_v29 = vrot.slane %v84_v25, %v100_v24 }
  0x45   :  { %v107_v30 = vsel %vm106_vm0, %v89_v26, 0.0  ;;  %v108_v31 = vsel %vm106_vm0, %v93_v27, 0.0  ;;  %v110_v32 = vsel %vm106_vm0, %v97_v28, 0.0  ;;  %v112_v34 = vsel %vm106_vm0, %v101_v29, 0.0 }
  0x46   :  { %v109_v33 = vadd.f32 %v108_v31, %v107_v30 }
  0x48   :  { %v111_v35 = vadd.f32 %v110_v32, %v109_v33 }
  0x4a   :  { %v113_v36 = vadd.f32 %v112_v34, %v111_v35 }
  0x4c   :  { %114 = vadd.xlane.f32.xlu0 %v113_v36 }
  0xd5   :  { %v115_v37 = vpop.xlane.xlu0 %114 }
  0xd6   :  { %v116_v38 = vrot.slane %v115_v37, 4 }
  0xd8   :  { %v117_v39 = vadd.f32 %v116_v38, %v115_v37 }
  0xda   :  { %v118_v40 = vrot.slane %v117_v39, 2 }
  0xdc   :  { %v119_v41 = vadd.f32 %v118_v40, %v117_v39 }
  0xde   :  { %v120_v42 = vrot.slane %v119_v41, 1 }
  0xe0   :  { %v121_v43 = vadd.f32 %v120_v42, %v119_v41 }
  0xe2   :  { %141 = vpush %v121_v43 }
 0x113   :  { %s142_s26 = spop %141 }
 0x114   :  { %v123_v44 = vstv %s142_s26 }
 0x115   :  { %124 = vst [vmem:[#allocation9] sm:$0xff] %v123_v44 }
 0x116   :  { %222 = shalt.err (!%p219_p5)
}
 0x117   :  { %134 = dma.vmem_to_hbm [thread:$0]  %s132_s2, 128, %s276_s3, [#allocation5]  }
 0x118   :  { %235 = dma.done.wait [#allocation5], 128  }
 0x119   :  { %236 = vsyncadd [#allocation5], 4294967168 }
 0x11a   :  { %138 = vsyncpa [#allocation4], 1 }
 0x11b   :  { %139 = vsyncpa [#allocation7], 1 }
 0x11c   :  { %140 = vsyncpa [#allocation5], 1 }

</bundles_post_ra>
